<compile_context>
chip_gen: v7x
topology: tpu7x:2x2x1
jax: 0.10.0
libtpu: 0.0.40
codegen_flags: <defaults>
</compile_context>

<pallas_src>
import math
import jax
import jax.numpy as jnp
from jax.experimental import pallas as pl
from jax.experimental.pallas import tpu as pltpu

_LANE = 128
_BN_EPS = 1e-5


def _round_up(n, m):
    return ((n + m - 1) // m) * m


def _pick_tile_n(n_pad):
    # Largest 128-multiple tile <= 512 that divides the padded feature dim.
    for t in (512, 384, 256, 128):
        if n_pad % t == 0:
            return t
    return _LANE


def _vmem_limit_bytes(B, k_src, k_tgt, tn, w_itemsize):
    # Explicit VMEM budget: double-buffered weight tiles + resident activations
    # + packed gamma/beta + output tile, with generous headroom for compiler
    # scratch.  Capped well below v7x's 64 MiB physical VMEM.
    w_bytes = 2 * (k_src + k_tgt) * tn * w_itemsize       # ws + wt, 2 buffers
    x_bytes = 2 * B * (k_src + k_tgt) * w_itemsize        # src + tgt, 2 buffers
    gb_bytes = 2 * 2 * tn * 4                             # packed gamma/beta
    out_bytes = 2 * B * tn * 4                            # f32 output tile
    total = w_bytes + x_bytes + gb_bytes + out_bytes
    return min(max(4 * total, 4 * 1024 * 1024), 48 * 1024 * 1024)


# ------------------------------- kernel --------------------------------------


def _path_encoder_bn_kernel(src_ref, tgt_ref, ws_ref, wt_ref, gb_ref, out_ref):
    # src: [B, hdim]  tgt: [B, path_dim]  ws: [hdim, TN]  wt: [path_dim, TN]
    # gb:  [2, TN] (row 0 = gamma, row 1 = beta)          out: [B, TN]
    # Two dots accumulate in f32; linear biases are omitted on purpose (the
    # batch-mean subtraction of BatchNorm cancels any per-feature constant).
    h = jnp.dot(src_ref[...], ws_ref[...], preferred_element_type=jnp.float32)
    h = h + jnp.dot(tgt_ref[...], wt_ref[...], preferred_element_type=jnp.float32)

    # BatchNorm1d (training-mode batch statistics), one-pass variance.
    mean = jnp.mean(h, axis=0, keepdims=True)
    var = jnp.maximum(jnp.mean(h * h, axis=0, keepdims=True) - mean * mean, 0.0)

    gamma = gb_ref[0:1, :]
    beta = gb_ref[1:2, :]
    s = gamma * jax.lax.rsqrt(var + _BN_EPS)    # [1, TN]
    t = beta - mean * s                         # [1, TN]
    out_ref[...] = jnp.maximum(h * s + t, 0.0).astype(out_ref.dtype)


# --------------------------- params & wrapper ---------------------------------


def init_params(key, hdim, path_dim):
    """Deterministic parameter init mirroring the PyTorch module's __init__."""
    k1, k2, k3, k4 = jax.random.split(key, 4)

    def xavier_uniform(k, fan_in, fan_out):
        bound = math.sqrt(6.0 / (fan_in + fan_out))
        # stored as [in, out] so the forward computes x @ W
        return jax.random.uniform(k, (fan_in, fan_out), jnp.float32, -bound, bound)

    def linear_bias(k, fan_in, fan_out):
        bound = 1.0 / math.sqrt(fan_in)
        return jax.random.uniform(k, (1, fan_out), jnp.float32, -bound, bound)

    return {
        "ws": xavier_uniform(k1, hdim, hdim),
        "bs": linear_bias(k2, hdim, hdim),
        "wt": xavier_uniform(k3, path_dim, hdim),
        "bt": linear_bias(k4, path_dim, hdim),
        # BatchNorm1d default affine init
        "gamma": jnp.ones((1, hdim), jnp.float32),
        "beta": jnp.zeros((1, hdim), jnp.float32),
    }


def prepare_params(params, hdim, *, param_dtype=jnp.float32):
    """One-time padding / packing / (optional) bf16 cast of the weights.

    param_dtype=jnp.bfloat16 halves the dominant HBM stream (weights) on all
    TPU generations; the cast happens exactly once here, never per forward
    call.  BN math and the kernel output stay f32 either way (relax the
    comparison tolerance when using bf16).
    """
    n_pad = _round_up(hdim, _LANE)
    pad_n = n_pad - hdim
    pad = lambda a: jnp.pad(a, ((0, 0), (0, pad_n)))
    return {
        "ws": pad(params["ws"]).astype(param_dtype),        # [hdim, n_pad]
        "wt": pad(params["wt"]).astype(param_dtype),        # [path_dim, n_pad]
        "bias": pad(params["bs"] + params["bt"]),           # [1, n_pad] f32 (B==1 path)
        # gamma zero-padded -> padded lanes come out exactly 0 after the BN FMA.
        "gb": jnp.concatenate([pad(params["gamma"]), pad(params["beta"])], axis=0),
        "hdim": hdim,
        "n_pad": n_pad,
        "param_dtype": jnp.dtype(param_dtype),
    }


def path_encoder_forward(src, tgt, fused, *, keep_padded=False):
    """Pallas implementation of PathEncoder.forward (training-mode BN)."""
    B, k_src = src.shape
    k_tgt = tgt.shape[1]
    hdim, n_pad = fused["hdim"], fused["n_pad"]
    dt = fused["param_dtype"]
    src = src.astype(dt)
    tgt = tgt.astype(dt)

    if B == 1:
        # A single output row can never amortise the fixed Pallas launch /
        # padded-store overhead -> plain XLA fusion: relu(x @ W + b).
        h = (jnp.dot(src, fused["ws"], preferred_element_type=jnp.float32)
             + jnp.dot(tgt, fused["wt"], preferred_element_type=jnp.float32)
             + fused["bias"])
        out = jnp.maximum(h, 0.0)
    else:
        tn = _pick_tile_n(n_pad)
        grid = (n_pad // tn,)
        # src/tgt block index never changes across the grid -> fetched once.
        # TODO(synk): on v7x at large B, pipeline_mode=pl.Buffered(1) on the
        # src/tgt specs would halve their resident VMEM footprint.
        src_spec = pl.BlockSpec((B, k_src), lambda j: (0, 0))
        tgt_spec = pl.BlockSpec((B, k_tgt), lambda j: (0, 0))
        ws_spec = pl.BlockSpec((k_src, tn), lambda j: (0, j))
        wt_spec = pl.BlockSpec((k_tgt, tn), lambda j: (0, j))
        gb_spec = pl.BlockSpec((2, tn), lambda j: (0, j))
        out_spec = pl.BlockSpec((B, tn), lambda j: (0, j))

        cparams = pltpu.CompilerParams(
            # Feature tiles are independent (BN stats are per-feature).
            dimension_semantics=("parallel",),
            vmem_limit_bytes=_vmem_limit_bytes(B, k_src, k_tgt, tn, dt.itemsize),
        )
        out = pl.pallas_call(
            _path_encoder_bn_kernel,
            out_shape=jax.ShapeDtypeStruct((B, n_pad), jnp.float32),
            grid=grid,
            in_specs=[src_spec, tgt_spec, ws_spec, wt_spec, gb_spec],
            out_specs=out_spec,
            compiler_params=cparams,
        )(src, tgt, fused["ws"], fused["wt"], fused["gb"])

    if keep_padded or n_pad == hdim:
        return out          # lane-dense 128-padded layout, no extra XLA copy
    return out[:, :hdim]


# ------------------------------- reference ------------------------------------


def _reference_forward(src, tgt, params):
    """Pure-JAX reference (mirrors the PyTorch module exactly, f32)."""
    h = src @ params["ws"] + params["bs"] + tgt @ params["wt"] + params["bt"]
    if src.shape[0] == 1:
        return jnp.maximum(h, 0.0)
    mean = jnp.mean(h, axis=0, keepdims=True)
    var = jnp.mean((h - mean) ** 2, axis=0, keepdims=True)
    h = (h - mean) / jnp.sqrt(var + _BN_EPS)
    h = h * params["gamma"] + params["beta"]
    return jnp.maximum(h, 0.0)


if __name__ == "__main__":
    B, hdim, path_dim = 8, 32, 16
    key = jax.random.PRNGKey(0)
    kp, ks, kt = jax.random.split(key, 3)

    params = init_params(kp, hdim, path_dim)
    src = jax.random.normal(ks, (B, hdim), jnp.float32)
    tgt = jax.random.normal(kt, (B, path_dim), jnp.float32)
    ref = _reference_forward(src, tgt, params)
    ref1 = _reference_forward(src[:1], tgt[:1], params)

    # f32 params: exact parity with the PyTorch reference (BN + ReLU, B > 1).
    fused = prepare_params(params, hdim)
    out = jax.block_until_ready(path_encoder_forward(src, tgt, fused))
    assert out.shape == (B, hdim)
    assert jnp.allclose(out, ref, atol=1e-4, rtol=1e-4)

    # B == 1 path: ReLU only, handled by a plain XLA fusion.
    out1 = jax.block_until_ready(path_encoder_forward(src[:1], tgt[:1], fused))
    assert out1.shape == (1, hdim)
    assert jnp.allclose(out1, ref1, atol=1e-4, rtol=1e-4)

    # bf16 weight/activation streaming (cast once at prepare time); f32 MXU
    # accumulation + f32 BN math -> relaxed tolerance vs. the f32 reference.
    fused_bf16 = prepare_params(params, hdim, param_dtype=jnp.bfloat16)
    out_bf16 = jax.block_until_ready(path_encoder_forward(src, tgt, fused_bf16))
    assert out_bf16.shape == (B, hdim)
    assert jnp.allclose(out_bf16, ref, atol=1e-1, rtol=1e-1)

    print("KERNEL_OK")
</pallas_src>

<mosaic_0001>
module attributes {stable_mosaic.version = 11 : i64} {
  func.func @_path_encoder_bn_kernel(%arg0: i32, %arg1: memref<8x32xf32, #tpu.memory_space<vmem>>, %arg2: memref<8x16xf32, #tpu.memory_space<vmem>>, %arg3: memref<32x128xf32, #tpu.memory_space<vmem>>, %arg4: memref<16x128xf32, #tpu.memory_space<vmem>>, %arg5: memref<2x128xf32, #tpu.memory_space<vmem>>, %arg6: memref<8x128xf32, #tpu.memory_space<vmem>>) attributes {dimension_semantics = [#tpu.dimension_semantics<parallel>], iteration_bounds = array<i64: 1>, scalar_prefetch = 0 : i64, scratch_operands = 0 : i64, tpu.core_type = #tpu.core_type<tc>, window_params = [{pipeline_mode = #tpu.pipeline_mode<synchronous>, transform_indices = @transform_0, window_bounds = array<i64: 8, 32>}, {pipeline_mode = #tpu.pipeline_mode<synchronous>, transform_indices = @transform_1, window_bounds = array<i64: 8, 16>}, {transform_indices = @transform_2, window_bounds = array<i64: 32, 128>}, {transform_indices = @transform_3, window_bounds = array<i64: 16, 128>}, {transform_indices = @transform_4, window_bounds = array<i64: 2, 128>}, {transform_indices = @transform_5, window_bounds = array<i64: 8, 128>}]} {
    %c0 = arith.constant 0 : index
    %c0_0 = arith.constant 0 : index
    %0 = vector.load %arg1[%c0, %c0_0] : memref<8x32xf32, #tpu.memory_space<vmem>>, vector<8x32xf32>
    %c0_1 = arith.constant 0 : index
    %c0_2 = arith.constant 0 : index
    %1 = vector.load %arg3[%c0_1, %c0_2] : memref<32x128xf32, #tpu.memory_space<vmem>>, vector<32x128xf32>
    %cst = arith.constant dense<0.000000e+00> : vector<8x128xf32>
    %2 = tpu.matmul %0, %1, %cst {dimension_numbers = #tpu.dot_dimension_numbers<[1], [0], [0], [1], [0, 0, 1, 1], [], []>} : vector<8x32xf32>, vector<32x128xf32>, vector<8x128xf32> -> vector<8x128xf32>
    %c0_3 = arith.constant 0 : index
    %c0_4 = arith.constant 0 : index
    %3 = vector.load %arg2[%c0_3, %c0_4] : memref<8x16xf32, #tpu.memory_space<vmem>>, vector<8x16xf32>
    %c0_5 = arith.constant 0 : index
    %c0_6 = arith.constant 0 : index
    %4 = vector.load %arg4[%c0_5, %c0_6] : memref<16x128xf32, #tpu.memory_space<vmem>>, vector<16x128xf32>
    %cst_7 = arith.constant dense<0.000000e+00> : vector<8x128xf32>
    %5 = tpu.matmul %3, %4, %cst_7 {dimension_numbers = #tpu.dot_dimension_numbers<[1], [0], [0], [1], [0, 0, 1, 1], [], []>} : vector<8x16xf32>, vector<16x128xf32>, vector<8x128xf32> -> vector<8x128xf32>
    %6 = arith.addf %2, %5 : vector<8x128xf32>
    %cst_8 = arith.constant dense<0.000000e+00> : vector<128xf32>
    %7 = vector.multi_reduction <add>, %6, %cst_8 [0] : vector<8x128xf32> to vector<128xf32>
    %8 = vector.shape_cast %7 : vector<128xf32> to vector<1x128xf32>
    %cst_9 = arith.constant 8.000000e+00 : f32
    %9 = vector.broadcast %cst_9 : f32 to vector<1x128xf32>
    %10 = arith.divf %8, %9 : vector<1x128xf32>
    %11 = arith.mulf %6, %6 : vector<8x128xf32>
    %cst_10 = arith.constant dense<0.000000e+00> : vector<128xf32>
    %12 = vector.multi_reduction <add>, %11, %cst_10 [0] : vector<8x128xf32> to vector<128xf32>
    %13 = vector.shape_cast %12 : vector<128xf32> to vector<1x128xf32>
    %cst_11 = arith.constant 8.000000e+00 : f32
    %14 = vector.broadcast %cst_11 : f32 to vector<1x128xf32>
    %15 = arith.divf %13, %14 : vector<1x128xf32>
    %16 = arith.mulf %10, %10 : vector<1x128xf32>
    %17 = arith.subf %15, %16 : vector<1x128xf32>
    %cst_12 = arith.constant 0.000000e+00 : f32
    %18 = vector.broadcast %cst_12 : f32 to vector<1x128xf32>
    %19 = arith.maximumf %17, %18 : vector<1x128xf32>
    %c0_13 = arith.constant 0 : index
    %c0_14 = arith.constant 0 : index
    %20 = vector.load %arg5[%c0_13, %c0_14] : memref<2x128xf32, #tpu.memory_space<vmem>>, vector<1x128xf32>
    %c1 = arith.constant 1 : index
    %c0_15 = arith.constant 0 : index
    %21 = vector.load %arg5[%c1, %c0_15] : memref<2x128xf32, #tpu.memory_space<vmem>>, vector<1x128xf32>
    %cst_16 = arith.constant 9.99999974E-6 : f32
    %22 = vector.broadcast %cst_16 : f32 to vector<1x128xf32>
    %23 = arith.addf %19, %22 : vector<1x128xf32>
    %24 = math.rsqrt %23 : vector<1x128xf32>
    %25 = arith.mulf %20, %24 : vector<1x128xf32>
    %26 = arith.mulf %10, %25 : vector<1x128xf32>
    %27 = arith.subf %21, %26 : vector<1x128xf32>
    %28 = vector.broadcast %25 : vector<1x128xf32> to vector<8x128xf32>
    %29 = arith.mulf %6, %28 : vector<8x128xf32>
    %30 = vector.broadcast %27 : vector<1x128xf32> to vector<8x128xf32>
    %31 = arith.addf %29, %30 : vector<8x128xf32>
    %cst_17 = arith.constant 0.000000e+00 : f32
    %32 = vector.broadcast %cst_17 : f32 to vector<8x128xf32>
    %33 = arith.maximumf %31, %32 : vector<8x128xf32>
    %c0_18 = arith.constant 0 : index
    %c0_19 = arith.constant 0 : index
    %34 = vector.load %arg6[%c0_18, %c0_19] : memref<8x128xf32, #tpu.memory_space<vmem>>, vector<8x128xf32>
    tpu.vector_store %arg6[%c0_18, %c0_19], %33 {strides = array<i32>} : memref<8x128xf32, #tpu.memory_space<vmem>>, vector<8x128xf32>,
    return
  }
  func.func @transform_0(%arg0: i32) -> (i32, i32) {
    %c0_i32 = arith.constant 0 : i32
    %c0_i32_0 = arith.constant 0 : i32
    %c0_i32_1 = arith.constant 0 : i32
    return %c0_i32, %c0_i32_0 : i32, i32
  }
  func.func @transform_1(%arg0: i32) -> (i32, i32) {
    %c0_i32 = arith.constant 0 : i32
    %c0_i32_0 = arith.constant 0 : i32
    %c0_i32_1 = arith.constant 0 : i32
    return %c0_i32, %c0_i32_0 : i32, i32
  }
  func.func @transform_2(%arg0: i32) -> (i32, i32) {
    %c0_i32 = arith.constant 0 : i32
    %c0_i32_0 = arith.constant 0 : i32
    return %c0_i32, %arg0 : i32, i32
  }
  func.func @transform_3(%arg0: i32) -> (i32, i32) {
    %c0_i32 = arith.constant 0 : i32
    %c0_i32_0 = arith.constant 0 : i32
    return %c0_i32, %arg0 : i32, i32
  }
  func.func @transform_4(%arg0: i32) -> (i32, i32) {
    %c0_i32 = arith.constant 0 : i32
    %c0_i32_0 = arith.constant 0 : i32
    return %c0_i32, %arg0 : i32, i32
  }
  func.func @transform_5(%arg0: i32) -> (i32, i32) {
    %c0_i32 = arith.constant 0 : i32
    %c0_i32_0 = arith.constant 0 : i32
    return %c0_i32, %arg0 : i32, i32
  }
}

</mosaic_0001>

<bundles_post_ra>
// kernel: tpu_custom_call.1
= control target key start
LH: loop header
LB: loop body
LE: loop exit
PB: predicated region body
PF: predicated region fallthrough
CT: control target
= control target key end

     0   :  { %10 = vsyncpa [#allocation3], 0  ;;  %s557_s0 = inlined_call_operand.hbm [shape: f32[8,32], index: 0, kind: input, shape index: {}]   ;;  %s558_s1 = inlined_call_operand.hbm [shape: f32[8,16], index: 1, kind: input, shape index: {}]   ;;  %s559_s2 = inlined_call_operand.hbm [shape: f32[32,128], index: 2, kind: input, shape index: {}]   ;;  %s560_s3 = inlined_call_operand.hbm [shape: f32[16,128], index: 3, kind: input, shape index: {}]   ;;  %s561_s4 = inlined_call_operand.vmem [shape: f32[2,128], index: 4, kind: input, shape index: {}]   ;;  %s562_s5 = inlined_call_operand.hbm [shape: f32[8,128], index: 5, kind: output, shape index: {}]  }
   0x1   :  { %11 = vsyncpa [#allocation6], 0 }
   0x2   :  { %12 = vsyncpa [#allocation9], 0 }
   0x3   :  { %13 = vsyncpa [#allocation4], 0  ;;  %s451_s18 = smov [#allocation5]   ;;  %s452_s20 = smov [#allocation2]  }
   0x4   :  { %s30_s19 = sshll.u32 %s451_s18, 4  ;;  %s20_s21 = sshll.u32 %s452_s20, 4  ;;  %s31_s19 = int_to_ptr.vmem [resolvable:$true] %s30_s19  ;;  %s21_s21 = int_to_ptr.vmem [resolvable:$true] %s20_s21 }
   0x5   :  { %s333_s24 = scalar_lea.hbm %s558_s1, 128 }
   0x6   :  { %p334_p0 = scmp.ne.s32.totalorder %s558_s1, %s333_s24  ;;  %p337_p1 = scmp.lt.u32.totalorder %s333_s24, %s558_s1 }
   0x8   :  { %p339_p2 = pnand %p337_p1, %p334_p0 }
   0xa   :  { %342 = shalt.err (!%p339_p2)
}
   0xb   :  { %s343_s29 = scalar_lea.vmem %s31_s19, 128  ;;  %p348_p4 = scmp.lt.s32.totalorder %s31_s19, %s31_s19 }
   0xc   :  { %p344_p3 = scmp.ne.s32.totalorder %s31_s19, %s343_s29  ;;  %p349_p5 = scmp.lt.s32.totalorder %s343_s29, %s343_s29 }
   0xe   :  { %p350_p6 = por %p349_p5, %p348_p4 }
  0x10   :  { %p351_p7 = pnand %p350_p6, %p344_p3 }
  0x12   :  { %354 = shalt.err (!%p351_p7)
}
  0x13   :  { %33 = dma.hbm_to_vmem [thread:$0]  %s558_s1, 128, %s31_s19, [#allocation6]  }
  0x14   :  { %s355_s9 = scalar_lea.hbm %s557_s0, 128 }
  0x15   :  { %p356_p8 = scmp.ne.s32.totalorder %s557_s0, %s355_s9  ;;  %p359_p9 = scmp.lt.u32.totalorder %s355_s9, %s557_s0 }
  0x17   :  { %p361_p10 = pnand %p359_p9, %p356_p8 }
  0x19   :  { %364 = shalt.err (!%p361_p10)
}
  0x1a   :  { %s365_s14 = scalar_lea.vmem %s21_s21, 128  ;;  %p370_p12 = scmp.lt.s32.totalorder %s21_s21, %s21_s21 }
  0x1b   :  { %p366_p11 = scmp.ne.s32.totalorder %s21_s21, %s365_s14  ;;  %p371_p13 = scmp.lt.s32.totalorder %s365_s14, %s365_s14 }
  0x1d   :  { %p372_p0 = por %p371_p13, %p370_p12 }
  0x1f   :  { %p373_p1 = pnand %p372_p0, %p366_p11 }
  0x21   :  { %376 = shalt.err (!%p373_p1)
}
  0x22   :  { %23 = dma.hbm_to_vmem [thread:$0]  %s557_s0, 128, %s21_s21, [#allocation3]  }
  0x23   :  { %s453_s16 = smov [#allocation7]   ;;  %s377_s20 = scalar_lea.hbm %s559_s2, 512 }
  0x24   :  { %s39_s17 = sshll.u32 %s453_s16, 4  ;;  %p378_p2 = scmp.ne.s32.totalorder %s559_s2, %s377_s20  ;;  %s40_s17 = int_to_ptr.vmem [resolvable:$true] %s39_s17 }
  0x25   :  { %p381_p3 = scmp.lt.u32.totalorder %s377_s20, %s559_s2 }
  0x27   :  { %p383_p4 = pnand %p381_p3, %p378_p2 }
  0x29   :  { %386 = shalt.err (!%p383_p4)
}
  0x2a   :  { %s387_s26 = scalar_lea.vmem %s40_s17, 512  ;;  %p392_p6 = scmp.lt.s32.totalorder %s40_s17, %s40_s17 }
  0x2b   :  { %p388_p5 = scmp.ne.s32.totalorder %s40_s17, %s387_s26  ;;  %p393_p7 = scmp.lt.s32.totalorder %s387_s26, %s387_s26 }
  0x2d   :  { %p394_p8 = por %p393_p7, %p392_p6 }
  0x2f   :  { %p395_p9 = pnand %p394_p8, %p388_p5 }
  0x31   :  { %398 = shalt.err (!%p395_p9)
}
  0x32   :  { %s454_s0 = smov 128   ;;  %s455_s21 = smov 8  }
  0x33   :  { %45 = dma.hbm_to_vmem [thread:$0]  %s559_s2, 512, %s40_s17, [#allocation6], %s454_s0, %s454_s0, %s455_s21  }
  0x34   :  { %s456_s29 = smov [#allocation8]   ;;  %s399_s8 = scalar_lea.hbm %s560_s3, 256 }
  0x35   :  { %s51_s30 = sshll.u32 %s456_s29, 4  ;;  %p400_p10 = scmp.ne.s32.totalorder %s560_s3, %s399_s8  ;;  %s52_s30 = int_to_ptr.vmem [resolvable:$true] %s51_s30 }
  0x36   :  { %p403_p11 = scmp.lt.u32.totalorder %s399_s8, %s560_s3 }
  0x38   :  { %p405_p12 = pnand %p403_p11, %p400_p10 }
  0x3a   :  { %408 = shalt.err (!%p405_p12)
}
  0x3b   :  { %s409_s13 = scalar_lea.vmem %s52_s30, 256  ;;  %p414_p0 = scmp.lt.s32.totalorder %s52_s30, %s52_s30 }
  0x3c   :  { %p410_p13 = scmp.ne.s32.totalorder %s52_s30, %s409_s13  ;;  %p415_p1 = scmp.lt.s32.totalorder %s409_s13, %s409_s13 }
  0x3e   :  { %p416_p2 = por %p415_p1, %p414_p0 }
  0x40   :  { %p417_p3 = pnand %p416_p2, %p410_p13 }
  0x42   :  { %420 = shalt.err (!%p417_p3)
}
  0x43   :  { %57 = dma.hbm_to_vmem [thread:$0]  %s560_s3, 256, %s52_s30, [#allocation9], %s454_s0, %s454_s0, %s455_s21  }
  0x44   :  { %443 = dma.done.wait [#allocation3], 128  }
  0x45   :  { %444 = vsyncadd [#allocation3], 4294967168 }
  0x46   :  { %445 = dma.done.wait [#allocation6], 640  }
  0x47   :  { %446 = vsyncadd [#allocation6], 4294966656 }
  0x48   :  { %447 = dma.done.wait [#allocation9], 256  }
  0x49   :  { %448 = vsyncadd [#allocation9], 4294967040  ;;  %v457_v0 = vmov 0.0|0.0   ;;  %vm458_vm0 = vmmov 0   ;;  %v459_v1 = vmov 0.0   ;;  %v73_v2 = vld [vmem:[#allocation7] sm:$0xff]  ;;  %v254_v37 = vlaneseq }
  0x4a   :  { %314 = vmatprep.subr.bf16.mxu0 %v457_v0  ;;  %311 = vmatprep.subr.bf16.mxu1 %v457_v0  ;;  %v74_v3 = vld [vmem:[#allocation7 + $0x8] sm:$0xff]  ;;  %v78_v4 = vld [vmem:[#allocation8] sm:$0xff]  ;;  %v75_v7 = vld [vmem:[#allocation7 + $0x10] sm:$0xff]  ;;  %vm80_vm1 = vcmask 130048   ;;  %vm154_vm2 = vcmask 261120   ;;  %s460_s17 = smov [#allocation10]  }
  0x4b   :  { %297 = vmatprep.mubr.msk.f32.mxu1 %vm458_vm0, %v459_v1  ;;  %308 = vmatprep.mubr.msk.f32.mxu0 %vm458_vm0, %v459_v1  ;;  %v315_v5 = vpack.c.bf16 %v74_v3, %v73_v2  ;;  %v79_v6 = vld [vmem:[#allocation8 + $0x8] sm:$0xff]  ;;  %v76_v8 = vld [vmem:[#allocation7 + $0x18] sm:$0xff]  ;;  %v72_v12 = vld [vmem:[#allocation2] sm:$0xff]  ;;  %v255_v38 = vshrl.u32 %v254_v37, 7  ;;  %s272_s18 = sshll.u32 %s460_s17, 4  ;;  %s273_s18 = int_to_ptr.vmem [resolvable:$true] %s272_s18 }
  0x4c   :  { %v312_v9 = vpack.c.bf16 %v79_v6, %v78_v4  ;;  %v318_v10 = vpack.c.bf16 %v76_v8, %v75_v7  ;;  %v77_v11 = vld [vmem:[#allocation5] sm:$0xff]  ;;  %v247_v39 = vld [vmem:[%s561_s4] sm:$0x1]  ;;  %v248_v43 = vld [vmem:[%s561_s4 + $0x1] sm:$0x1]  ;;  %s421_s19 = scalar_lea.vmem %s273_s18, 128  ;;  %p426_p5 = scmp.lt.s32.totalorder %s273_s18, %s273_s18 }
  0x4d   :  { %316 = vmatpush3.bf16.msra.mxu0 %v315_v5  ;;  %v256_v40 = vsub.s32 0, %v255_v38  ;;  %p422_p4 = scmp.ne.s32.totalorder %s273_s18, %s421_s19  ;;  %p427_p6 = scmp.lt.s32.totalorder %s421_s19, %s421_s19 }
  0x4e   :  { %313 = vmatpush3.bf16.msra.mxu1 %v312_v9  ;;  %317 = vmatprep.subr.bf16.mxu0 %v457_v0 }
  0x4f   :  { %p428_p7 = por %p427_p6, %p426_p5 }
  0x51   :  { %319 = vmatpush3.bf16.msra.mxu0 %v318_v10  ;;  %298 = vmatmul.mubr.msk.f32.vlgmr.msra.gmra.mrb[0].mxu1 %vm80_vm1, %v77_v11  ;;  %p429_p8 = pnand %p428_p7, %p422_p4 }
  0x54   :  { %309 = vmatmul.mubr.msk.f32.vlgmr.msra.gmra.mrb[0].mxu0 %vm154_vm2, %v72_v12 }
 0x124   :  { %v150_v13 = vpop.f32.mrb[0].mxu1 }
 0x125   :  { %v299_v14 = vpop.f32.mrb[1].mxu1 }
 0x127   :  { %v224_v15 = vpop.f32.mrb[0].mxu0 }
 0x128   :  { %v225_v16 = vadd.f32 %v224_v15, %v150_v13  ;;  %v310_v17 = vpop.f32.mrb[1].mxu0 }
 0x12a   :  { %v228_v18 = vrot.slane %v225_v16, 4  ;;  %v236_v19 = vmul.f32 %v225_v16, %v225_v16 }
 0x12c   :  { %v229_v20 = vadd.f32 %v228_v18, %v225_v16  ;;  %v237_v21 = vrot.slane %v236_v19, 4 }
 0x12e   :  { %v230_v22 = vrot.slane %v229_v20, 2  ;;  %v238_v23 = vadd.f32 %v237_v21, %v236_v19 }
 0x130   :  { %v231_v24 = vadd.f32 %v230_v22, %v229_v20  ;;  %v239_v25 = vrot.slane %v238_v23, 2 }
 0x132   :  { %v232_v26 = vrot.slane %v231_v24, 1  ;;  %v240_v27 = vadd.f32 %v239_v25, %v238_v23 }
 0x134   :  { %v233_v28 = vadd.f32 %v232_v26, %v231_v24  ;;  %v241_v29 = vrot.slane %v240_v27, 1 }
 0x136   :  { %v242_v30 = vadd.f32 %v241_v29, %v240_v27  ;;  %v235_v31 = vmul.f32 0.125, %v233_v28 }
 0x138   :  { %v243_v32 = vmul.f32 0.125, %v242_v30  ;;  %v244_v33 = vmul.f32 %v235_v31, %v235_v31 }
 0x13a   :  { %v245_v34 = vsub.f32 %v243_v32, %v244_v33 }
 0x13c   :  { %v246_v35 = vmax.f32 %v245_v34, 0.0 }
 0x13e   :  { %v249_v36 = vadd.f32 1e-05, %v246_v35 }
 0x140   :  { %331 = vrsqrt.f32 %v249_v36 }
 0x14a   :  { %v332_v41 = vpop.eup %331 }
 0x14b   :  { %v251_v42 = vmul.f32 %v332_v41, %v247_v39 }
 0x14d   :  { %v252_v44 = vmul.f32 %v251_v42, %v235_v31  ;;  %v257_v45 = vrot.slane %v251_v42, %v256_v40 }
 0x14f   :  { %v253_v46 = vsub.f32 %v248_v43, %v252_v44  ;;  %v258_v47 = vmul.f32 %v257_v45, %v225_v16 }
 0x151   :  { %v262_v48 = vrot.slane %v253_v46, %v256_v40 }
 0x153   :  { %v263_v49 = vadd.f32 %v262_v48, %v258_v47 }
 0x155   :  { %v264_v50 = vmax.f32 %v263_v49, 0.0 }
 0x157   :  { %265 = vst [vmem:[#allocation10] sm:$0xff] %v264_v50 }
 0x158   :  { %432 = shalt.err (!%p429_p8)
}
 0x159   :  { %s433_s22 = scalar_lea.hbm %s562_s5, 128 }
 0x15a   :  { %p434_p9 = scmp.ne.s32.totalorder %s562_s5, %s433_s22  ;;  %p437_p10 = scmp.lt.u32.totalorder %s433_s22, %s562_s5 }
 0x15c   :  { %p439_p11 = pnand %p437_p10, %p434_p9 }
 0x15e   :  { %442 = shalt.err (!%p439_p11)
}
 0x15f   :  { %275 = dma.vmem_to_hbm [thread:$0]  %s273_s18, 128, %s562_s5, [#allocation4]  }
 0x160   :  { %449 = dma.done.wait [#allocation4], 128  }
 0x161   :  { %450 = vsyncadd [#allocation4], 4294967168 }
 0x162   :  { %279 = vsyncpa [#allocation3], 1 }
 0x163   :  { %280 = vsyncpa [#allocation6], 1 }
 0x164   :  { %281 = vsyncpa [#allocation9], 1 }
 0x165   :  { %282 = vsyncpa [#allocation4], 1 }

</bundles_post_ra>
